<compile_context>
chip_gen: v6e
topology: v6e:2x2x1
jax: 0.10.0
libtpu: 0.0.40
codegen_flags: <defaults>
</compile_context>

<pallas_src>
import functools

import jax
import jax.numpy as jnp
from jax import lax
from jax.experimental import pallas as pl
from jax.experimental.pallas import tpu as pltpu

EPS = 1e-5
LANE = 128
SUBLANE = 8
VMEM_LIMIT = 48 * 1024 * 1024   # conservative; fits v7x's 64 MiB physical VMEM


def _ceil_to(x, m):
    return (x + m - 1) // m * m


def _pad2d(a, rows, cols):
    r, c = a.shape
    return jnp.pad(a, ((0, rows - r), (0, cols - c)))


# ----------------------------- Pallas kernels ------------------------------ #

def matmul_stats_kernel(p_ref, w_ref, z_ref, sum_ref, ssq_ref, acc_s, acc_q):
    """One M-tile of conv-as-matmul (bf16 in, f32 acc).  Accumulates per-channel
    sum and sum-of-squares across the M grid axis for training-mode BatchNorm."""
    i = pl.program_id(0)

    @pl.when(i == 0)
    def _():
        acc_s[...] = jnp.zeros_like(acc_s)
        acc_q[...] = jnp.zeros_like(acc_q)

    z = jnp.dot(p_ref[...], w_ref[...], preferred_element_type=jnp.float32)
    z_ref[...] = z
    acc_s[...] += jnp.sum(z, axis=0, keepdims=True)
    acc_q[...] += jnp.sum(z * z, axis=0, keepdims=True)

    @pl.when(i == pl.num_programs(0) - 1)
    def _():
        sum_ref[...] = acc_s[...]
        ssq_ref[...] = acc_q[...]


def _bn_affine(z, s, q, g, b, inv_count):
    # Training-mode batch norm from accumulated sums (f32): biased variance.
    mean = s * inv_count
    var = q * inv_count - mean * mean
    scale = g * lax.rsqrt(var + EPS)
    return z * scale + (b - mean * scale)


def bn_relu_kernel(z_ref, s_ref, q_ref, g_ref, b_ref, y_ref, *, inv_count):
    y = _bn_affine(z_ref[...], s_ref[...], q_ref[...], g_ref[...], b_ref[...],
                   inv_count)
    y_ref[...] = jnp.maximum(y, 0.0).astype(y_ref.dtype)


def final_proj_kernel(z2_ref, s2_ref, q2_ref, g2_ref, b2_ref,
                      zsc_ref, ssc_ref, qsc_ref, gsc_ref, bsc_ref,
                      o_ref, *, inv_count):
    main = _bn_affine(z2_ref[...], s2_ref[...], q2_ref[...], g2_ref[...],
                      b2_ref[...], inv_count)
    short = _bn_affine(zsc_ref[...], ssc_ref[...], qsc_ref[...], gsc_ref[...],
                       bsc_ref[...], inv_count)
    o_ref[...] = jnp.maximum(main + short, 0.0).astype(o_ref.dtype)


def final_id_kernel(z2_ref, s2_ref, q2_ref, g2_ref, b2_ref, x_ref, o_ref, *,
                    inv_count):
    main = _bn_affine(z2_ref[...], s2_ref[...], q2_ref[...], g2_ref[...],
                      b2_ref[...], inv_count)
    o_ref[...] = jnp.maximum(main + x_ref[...], 0.0).astype(o_ref.dtype)


# --------------------------- pallas_call wrappers --------------------------- #

def _compiler_params(semantics):
    return pltpu.CompilerParams(dimension_semantics=semantics,
                                vmem_limit_bytes=VMEM_LIMIT)


def _matmul_stats(p, w, tile_m):
    """p: [Mp, Kp] bf16, w: [Kp, Cp] bf16 -> z [Mp, Cp] f32, sum/ssq [1, Cp] f32."""
    Mp, Kp = p.shape
    Cp = w.shape[1]
    tile = pl.BlockSpec((tile_m, Kp), lambda i: (i, 0))
    wspec = pl.BlockSpec((Kp, Cp), lambda i: (0, 0))        # weights stay resident
    ztile = pl.BlockSpec((tile_m, Cp), lambda i: (i, 0))
    stat = pl.BlockSpec((1, Cp), lambda i: (0, 0))
    cost = pl.CostEstimate(
        flops=2 * Mp * Kp * Cp, transcendentals=0,
        bytes_accessed=p.size * 2 + w.size * 2 + Mp * Cp * 4 + 2 * Cp * 4)
    return pl.pallas_call(
        matmul_stats_kernel,
        grid=(Mp // tile_m,),
        in_specs=[tile, wspec],
        out_specs=(ztile, stat, stat),
        out_shape=(jax.ShapeDtypeStruct((Mp, Cp), jnp.float32),
                   jax.ShapeDtypeStruct((1, Cp), jnp.float32),
                   jax.ShapeDtypeStruct((1, Cp), jnp.float32)),
        scratch_shapes=[pltpu.VMEM((1, Cp), jnp.float32),
                        pltpu.VMEM((1, Cp), jnp.float32)],
        compiler_params=_compiler_params(("arbitrary",)),   # stats reduce over M
        cost_estimate=cost,
    )(p, w)


def _bn_relu(z, s, q, g, b, inv_count, tile_m):
    Mp, Cp = z.shape
    tile = pl.BlockSpec((tile_m, Cp), lambda i: (i, 0))
    chan = pl.BlockSpec((1, Cp), lambda i: (0, 0))
    return pl.pallas_call(
        functools.partial(bn_relu_kernel, inv_count=inv_count),
        grid=(Mp // tile_m,),
        in_specs=[tile, chan, chan, chan, chan],
        out_specs=tile,
        out_shape=jax.ShapeDtypeStruct((Mp, Cp), jnp.bfloat16),
        compiler_params=_compiler_params(("parallel",)),
    )(z, s, q, g, b)


def _final_proj(z2, s2, q2, g2, b2, zsc, ssc, qsc, gsc, bsc, inv_count, tile_m):
    Mp, Cp = z2.shape
    tile = pl.BlockSpec((tile_m, Cp), lambda i: (i, 0))
    chan = pl.BlockSpec((1, Cp), lambda i: (0, 0))
    return pl.pallas_call(
        functools.partial(final_proj_kernel, inv_count=inv_count),
        grid=(Mp // tile_m,),
        in_specs=[tile, chan, chan, chan, chan, tile, chan, chan, chan, chan],
        out_specs=tile,
        out_shape=jax.ShapeDtypeStruct((Mp, Cp), jnp.float32),
        compiler_params=_compiler_params(("parallel",)),
    )(z2, s2, q2, g2, b2, zsc, ssc, qsc, gsc, bsc)


def _final_id(z2, s2, q2, g2, b2, x, inv_count, tile_m):
    Mp, Cp = z2.shape
    tile = pl.BlockSpec((tile_m, Cp), lambda i: (i, 0))
    chan = pl.BlockSpec((1, Cp), lambda i: (0, 0))
    return pl.pallas_call(
        functools.partial(final_id_kernel, inv_count=inv_count),
        grid=(Mp // tile_m,),
        in_specs=[tile, chan, chan, chan, chan, tile],
        out_specs=tile,
        out_shape=jax.ShapeDtypeStruct((Mp, Cp), jnp.float32),
        compiler_params=_compiler_params(("parallel",)),
    )(z2, s2, q2, g2, b2, x)


# ------------------------------- JAX glue ----------------------------------- #

def im2col(x, ksize, stride, pad):
    """x: [B,H,W,C] -> patches [B*Ho*Wo, ksize*ksize*C] (tap-major, C-minor)."""
    B, H, W, C = x.shape
    xp = jnp.pad(x, ((0, 0), (pad, pad), (pad, pad), (0, 0)))
    Ho = (H + 2 * pad - ksize) // stride + 1
    Wo = (W + 2 * pad - ksize) // stride + 1
    taps = []
    for kh in range(ksize):
        for kw in range(ksize):
            taps.append(xp[:, kh:kh + stride * (Ho - 1) + 1:stride,
                           kw:kw + stride * (Wo - 1) + 1:stride, :])
    p = jnp.stack(taps, axis=3)   # [B, Ho, Wo, k*k, C]
    return p.reshape(B * Ho * Wo, ksize * ksize * C), Ho, Wo


def basic_block_forward(x_nhwc, params, stride, *, tile_m=512):
    """BasicBlock forward.  x_nhwc: [B,H,W,Cin] f32 -> [B,Ho,Wo,Cout] f32."""
    B, H, W, Cin = x_nhwc.shape
    Cout = params["w1"].shape[-1]
    Cp = _ceil_to(Cout, LANE)                       # lane-dense channel padding

    # ---- stage 1: conv3x3(stride) as matmul + BN stats, then BN+ReLU apply ----
    p1, Ho, Wo = im2col(x_nhwc, 3, stride, 1)
    M = B * Ho * Wo
    tile_m = _ceil_to(min(tile_m, _ceil_to(M, SUBLANE)), SUBLANE)
    Mp = _ceil_to(M, tile_m)
    inv_count = 1.0 / M          # padded rows are all-zero -> contribute 0 to sums

    K1p = _ceil_to(9 * Cin, LANE)
    p1 = _pad2d(p1, Mp, K1p).astype(jnp.bfloat16)
    w1 = _pad2d(params["w1"].reshape(9 * Cin, Cout), K1p, Cp).astype(jnp.bfloat16)
    z1, s1, q1 = _matmul_stats(p1, w1, tile_m)
    g1 = _pad2d(params["g1"].reshape(1, Cout), 1, Cp)
    b1 = _pad2d(params["b1"].reshape(1, Cout), 1, Cp)
    y1 = _bn_relu(z1, s1, q1, g1, b1, inv_count, tile_m)       # bf16, lane-dense

    # ---- stage 2: conv3x3(stride=1) as matmul + BN stats ----
    y1_nhwc = y1[:M, :Cout].reshape(B, Ho, Wo, Cout)
    p2, _, _ = im2col(y1_nhwc, 3, 1, 1)                        # bf16 patches
    K2p = _ceil_to(9 * Cout, LANE)
    p2 = _pad2d(p2, Mp, K2p)
    w2 = _pad2d(params["w2"].reshape(9 * Cout, Cout), K2p, Cp).astype(jnp.bfloat16)
    z2, s2, q2 = _matmul_stats(p2, w2, tile_m)
    g2 = _pad2d(params["g2"].reshape(1, Cout), 1, Cp)
    b2 = _pad2d(params["b2"].reshape(1, Cout), 1, Cp)

    # ---- shortcut branch + BN2 apply + residual add + ReLU ----
    if stride != 1 or Cin != Cout:
        # projection shortcut: 1x1 conv (stride) == strided spatial sub-sampling
        xs = x_nhwc[:, ::stride, ::stride, :].reshape(M, Cin)
        Kscp = _ceil_to(Cin, LANE)
        xs = _pad2d(xs, Mp, Kscp).astype(jnp.bfloat16)
        wsc = _pad2d(params["wsc"].reshape(Cin, Cout), Kscp, Cp).astype(jnp.bfloat16)
        zsc, ssc, qsc = _matmul_stats(xs, wsc, tile_m)
        gsc = _pad2d(params["gsc"].reshape(1, Cout), 1, Cp)
        bsc = _pad2d(params["bsc"].reshape(1, Cout), 1, Cp)
        out = _final_proj(z2, s2, q2, g2, b2, zsc, ssc, qsc, gsc, bsc,
                          inv_count, tile_m)
    else:
        shortcut = _pad2d(x_nhwc.reshape(M, Cin).astype(jnp.float32), Mp, Cp)
        out = _final_id(z2, s2, q2, g2, b2, shortcut, inv_count, tile_m)

    return out[:M, :Cout].reshape(B, Ho, Wo, Cout)


# --------------------------- pure-JAX reference ------------------------------ #

def _conv_ref(x, w, stride, pad):
    return lax.conv_general_dilated(
        x, w, window_strides=(stride, stride),
        padding=((pad, pad), (pad, pad)),
        dimension_numbers=("NHWC", "HWIO", "NHWC"),
        precision=lax.Precision.HIGHEST)


def _bn_ref(x, gamma, beta):
    mean = jnp.mean(x, axis=(0, 1, 2), keepdims=True)
    var = jnp.mean((x - mean) ** 2, axis=(0, 1, 2), keepdims=True)
    return gamma.reshape(1, 1, 1, -1) * (x - mean) * lax.rsqrt(var + EPS) \
        + beta.reshape(1, 1, 1, -1)


def basic_block_ref(x, params, stride, mxu_bf16=False):
    """Pure-JAX reference.  With mxu_bf16=True, matmul *inputs* are rounded to
    bf16 (f32 accumulation) to mirror the Pallas kernels' MXU feed exactly."""
    cast = ((lambda a: a.astype(jnp.bfloat16).astype(jnp.float32))
            if mxu_bf16 else (lambda a: a))
    Cin, Cout = x.shape[-1], params["w1"].shape[-1]
    y = _conv_ref(cast(x), cast(params["w1"]), stride, 1)
    y = jnp.maximum(_bn_ref(y, params["g1"], params["b1"]), 0.0)
    y = _conv_ref(cast(y), cast(params["w2"]), 1, 1)
    y = _bn_ref(y, params["g2"], params["b2"])
    if stride != 1 or Cin != Cout:
        s = _conv_ref(cast(x), cast(params["wsc"].reshape(1, 1, Cin, Cout)),
                      stride, 0)
        s = _bn_ref(s, params["gsc"], params["bsc"])
    else:
        s = x
    return jnp.maximum(y + s, 0.0)


# ---------------------------------- main ------------------------------------ #

def _init_params(key, Cin, Cout, proj):
    ks = jax.random.split(key, 9)
    p = {
        "w1": 0.1 * jax.random.normal(ks[0], (3, 3, Cin, Cout), jnp.float32),
        "g1": 1.0 + 0.1 * jax.random.normal(ks[1], (Cout,), jnp.float32),
        "b1": 0.1 * jax.random.normal(ks[2], (Cout,), jnp.float32),
        "w2": 0.1 * jax.random.normal(ks[3], (3, 3, Cout, Cout), jnp.float32),
        "g2": 1.0 + 0.1 * jax.random.normal(ks[4], (Cout,), jnp.float32),
        "b2": 0.1 * jax.random.normal(ks[5], (Cout,), jnp.float32),
    }
    if proj:
        p["wsc"] = 0.1 * jax.random.normal(ks[6], (Cin, Cout), jnp.float32)
        p["gsc"] = 1.0 + 0.1 * jax.random.normal(ks[7], (Cout,), jnp.float32)
        p["bsc"] = 0.1 * jax.random.normal(ks[8], (Cout,), jnp.float32)
    return p


if __name__ == "__main__":
    key = jax.random.PRNGKey(0)
    kp, kx = jax.random.split(key)

    configs = [
        dict(B=2, Cin=4, Cout=8, H=16, W=16, stride=2),   # projection shortcut
        dict(B=2, Cin=8, Cout=8, H=16, W=16, stride=1),   # identity shortcut
    ]

    for idx, cfg in enumerate(configs):
        proj = cfg["stride"] != 1 or cfg["Cin"] != cfg["Cout"]
        params = _init_params(jax.random.fold_in(kp, idx),
                              cfg["Cin"], cfg["Cout"], proj)
        # PyTorch-style NCHW input -> NHWC for the kernel.
        x_nchw = jax.random.normal(jax.random.fold_in(kx, idx),
                                   (cfg["B"], cfg["Cin"], cfg["H"], cfg["W"]),
                                   jnp.float32)
        x_nhwc = jnp.transpose(x_nchw, (0, 2, 3, 1))

        # tile_m=64 at these small shapes -> multiple M tiles, exercising the
        # cross-tile BN sum/sumsq reduction path.
        out = jax.block_until_ready(
            basic_block_forward(x_nhwc, params, cfg["stride"], tile_m=64))

        Ho = (cfg["H"] + 2 - 3) // cfg["stride"] + 1
        Wo = (cfg["W"] + 2 - 3) // cfg["stride"] + 1
        assert out.shape == (cfg["B"], Ho, Wo, cfg["Cout"]), out.shape

        # Tight check vs. a reference that mirrors the bf16 MXU feed ...
        ref_bf16 = basic_block_ref(x_nhwc, params, cfg["stride"], mxu_bf16=True)
        if not jnp.allclose(out, ref_bf16, rtol=5e-3, atol=5e-3):
            raise AssertionError(f"config {idx}: mismatch vs bf16-feed reference")
        # ... and a looser sanity check vs. the full-f32 reference.
        ref_f32 = basic_block_ref(x_nhwc, params, cfg["stride"], mxu_bf16=False)
        if not jnp.allclose(out, ref_f32, rtol=5e-2, atol=5e-2):
            raise AssertionError(f"config {idx}: mismatch vs f32 reference")

    print("KERNEL_OK")
</pallas_src>

<mosaic_0001>
module attributes {stable_mosaic.version = 11 : i64} {
  func.func @matmul_stats_kernel(%arg0: i32, %arg1: memref<64x128xbf16, #tpu.memory_space<vmem>>, %arg2: memref<128x128xbf16, #tpu.memory_space<vmem>>, %arg3: memref<64x128xf32, #tpu.memory_space<vmem>>, %arg4: memref<1x128xf32, #tpu.memory_space<vmem>>, %arg5: memref<1x128xf32, #tpu.memory_space<vmem>>, %arg6: memref<1x128xf32, #tpu.memory_space<vmem>>, %arg7: memref<1x128xf32, #tpu.memory_space<vmem>>) attributes {dimension_semantics = [#tpu.dimension_semantics<arbitrary>], iteration_bounds = array<i64: 2>, scalar_prefetch = 0 : i64, scratch_operands = 2 : i64, tpu.core_type = #tpu.core_type<tc>, window_params = [{transform_indices = @transform_0, window_bounds = array<i64: 64, 128>}, {pipeline_mode = #tpu.pipeline_mode<synchronous>, transform_indices = @transform_1, window_bounds = array<i64: 128, 128>}, {transform_indices = @transform_2, window_bounds = array<i64: 64, 128>}, {pipeline_mode = #tpu.pipeline_mode<synchronous>, transform_indices = @transform_3, window_bounds = array<i64: 1, 128>}, {pipeline_mode = #tpu.pipeline_mode<synchronous>, transform_indices = @transform_4, window_bounds = array<i64: 1, 128>}]} {
    %c0_i32 = arith.constant 0 : i32
    %0 = arith.cmpi eq, %arg0, %c0_i32 : i32
    %1 = arith.extui %0 : i1 to i32
    %c0_i32_0 = arith.constant 0 : i32
    %2 = arith.cmpi ne, %1, %c0_i32_0 : i32
    scf.if %2 {
      %cst_17 = arith.constant 0.000000e+00 : f32
      %21 = vector.broadcast %cst_17 : f32 to vector<1x128xf32>
      %c0_18 = arith.constant 0 : index
      %c0_19 = arith.constant 0 : index
      %22 = vector.load %arg6[%c0_18, %c0_19] : memref<1x128xf32, #tpu.memory_space<vmem>>, vector<1x128xf32>
      tpu.vector_store %arg6[%c0_18, %c0_19], %21 {strides = array<i32>} : memref<1x128xf32, #tpu.memory_space<vmem>>, vector<1x128xf32>,
      %cst_20 = arith.constant 0.000000e+00 : f32
      %23 = vector.broadcast %cst_20 : f32 to vector<1x128xf32>
      %c0_21 = arith.constant 0 : index
      %c0_22 = arith.constant 0 : index
      %24 = vector.load %arg7[%c0_21, %c0_22] : memref<1x128xf32, #tpu.memory_space<vmem>>, vector<1x128xf32>
      tpu.vector_store %arg7[%c0_21, %c0_22], %23 {strides = array<i32>} : memref<1x128xf32, #tpu.memory_space<vmem>>, vector<1x128xf32>,
    } else {
    }
    %c0 = arith.constant 0 : index
    %c0_1 = arith.constant 0 : index
    %3 = vector.load %arg1[%c0, %c0_1] : memref<64x128xbf16, #tpu.memory_space<vmem>>, vector<64x128xbf16>
    %c0_2 = arith.constant 0 : index
    %c0_3 = arith.constant 0 : index
    %4 = vector.load %arg2[%c0_2, %c0_3] : memref<128x128xbf16, #tpu.memory_space<vmem>>, vector<128x128xbf16>
    %cst = arith.constant dense<0.000000e+00> : vector<64x128xf32>
    %5 = tpu.matmul %3, %4, %cst {dimension_numbers = #tpu.dot_dimension_numbers<[1], [0], [0], [1], [0, 0, 1, 1], [], []>} : vector<64x128xbf16>, vector<128x128xbf16>, vector<64x128xf32> -> vector<64x128xf32>
    %c0_4 = arith.constant 0 : index
    %c0_5 = arith.constant 0 : index
    %6 = vector.load %arg3[%c0_4, %c0_5] : memref<64x128xf32, #tpu.memory_space<vmem>>, vector<64x128xf32>
    tpu.vector_store %arg3[%c0_4, %c0_5], %5 {strides = array<i32>} : memref<64x128xf32, #tpu.memory_space<vmem>>, vector<64x128xf32>,
    %c0_6 = arith.constant 0 : index
    %c0_7 = arith.constant 0 : index
    %7 = vector.load %arg6[%c0_6, %c0_7] : memref<1x128xf32, #tpu.memory_space<vmem>>, vector<1x128xf32>
    %cst_8 = arith.constant dense<0.000000e+00> : vector<128xf32>
    %8 = vector.multi_reduction <add>, %5, %cst_8 [0] : vector<64x128xf32> to vector<128xf32>
    %9 = vector.shape_cast %8 : vector<128xf32> to vector<1x128xf32>
    %10 = arith.addf %7, %9 : vector<1x128xf32>
    %c0_9 = arith.constant 0 : index
    %c0_10 = arith.constant 0 : index
    %11 = vector.load %arg6[%c0_9, %c0_10] : memref<1x128xf32, #tpu.memory_space<vmem>>, vector<1x128xf32>
    tpu.vector_store %arg6[%c0_9, %c0_10], %10 {strides = array<i32>} : memref<1x128xf32, #tpu.memory_space<vmem>>, vector<1x128xf32>,
    %c0_11 = arith.constant 0 : index
    %c0_12 = arith.constant 0 : index
    %12 = vector.load %arg7[%c0_11, %c0_12] : memref<1x128xf32, #tpu.memory_space<vmem>>, vector<1x128xf32>
    %13 = arith.mulf %5, %5 : vector<64x128xf32>
    %cst_13 = arith.constant dense<0.000000e+00> : vector<128xf32>
    %14 = vector.multi_reduction <add>, %13, %cst_13 [0] : vector<64x128xf32> to vector<128xf32>
    %15 = vector.shape_cast %14 : vector<128xf32> to vector<1x128xf32>
    %16 = arith.addf %12, %15 : vector<1x128xf32>
    %c0_14 = arith.constant 0 : index
    %c0_15 = arith.constant 0 : index
    %17 = vector.load %arg7[%c0_14, %c0_15] : memref<1x128xf32, #tpu.memory_space<vmem>>, vector<1x128xf32>
    tpu.vector_store %arg7[%c0_14, %c0_15], %16 {strides = array<i32>} : memref<1x128xf32, #tpu.memory_space<vmem>>, vector<1x128xf32>,
    %c1_i32 = arith.constant 1 : i32
    %18 = arith.cmpi eq, %arg0, %c1_i32 : i32
    %19 = arith.extui %18 : i1 to i32
    %c0_i32_16 = arith.constant 0 : i32
    %20 = arith.cmpi ne, %19, %c0_i32_16 : i32
    scf.if %20 {
      %c0_17 = arith.constant 0 : index
      %c0_18 = arith.constant 0 : index
      %21 = vector.load %arg6[%c0_17, %c0_18] : memref<1x128xf32, #tpu.memory_space<vmem>>, vector<1x128xf32>
      %c0_19 = arith.constant 0 : index
      %c0_20 = arith.constant 0 : index
      %22 = vector.load %arg4[%c0_19, %c0_20] : memref<1x128xf32, #tpu.memory_space<vmem>>, vector<1x128xf32>
      tpu.vector_store %arg4[%c0_19, %c0_20], %21 {strides = array<i32>} : memref<1x128xf32, #tpu.memory_space<vmem>>, vector<1x128xf32>,
      %c0_21 = arith.constant 0 : index
      %c0_22 = arith.constant 0 : index
      %23 = vector.load %arg7[%c0_21, %c0_22] : memref<1x128xf32, #tpu.memory_space<vmem>>, vector<1x128xf32>
      %c0_23 = arith.constant 0 : index
      %c0_24 = arith.constant 0 : index
      %24 = vector.load %arg5[%c0_23, %c0_24] : memref<1x128xf32, #tpu.memory_space<vmem>>, vector<1x128xf32>
      tpu.vector_store %arg5[%c0_23, %c0_24], %23 {strides = array<i32>} : memref<1x128xf32, #tpu.memory_space<vmem>>, vector<1x128xf32>,
    } else {
    }
    return
  }
  func.func @transform_0(%arg0: i32) -> (i32, i32) {
    %c0_i32 = arith.constant 0 : i32
    %c0_i32_0 = arith.constant 0 : i32
    return %arg0, %c0_i32 : i32, i32
  }
  func.func @transform_1(%arg0: i32) -> (i32, i32) {
    %c0_i32 = arith.constant 0 : i32
    %c0_i32_0 = arith.constant 0 : i32
    %c0_i32_1 = arith.constant 0 : i32
    return %c0_i32, %c0_i32_0 : i32, i32
  }
  func.func @transform_2(%arg0: i32) -> (i32, i32) {
    %c0_i32 = arith.constant 0 : i32
    %c0_i32_0 = arith.constant 0 : i32
    return %arg0, %c0_i32 : i32, i32
  }
  func.func @transform_3(%arg0: i32) -> (i32, i32) {
    %c0_i32 = arith.constant 0 : i32
    %c0_i32_0 = arith.constant 0 : i32
    %c0_i32_1 = arith.constant 0 : i32
    return %c0_i32, %c0_i32_0 : i32, i32
  }
  func.func @transform_4(%arg0: i32) -> (i32, i32) {
    %c0_i32 = arith.constant 0 : i32
    %c0_i32_0 = arith.constant 0 : i32
    %c0_i32_1 = arith.constant 0 : i32
    return %c0_i32, %c0_i32_0 : i32, i32
  }
}

</mosaic_0001>

<bundles_post_ra>
// kernel: tpu_custom_call.1
= control target key start
LH: loop header
LB: loop body
LE: loop exit
PB: predicated region body
PF: predicated region fallthrough
CT: control target
= control target key end

     0   :  { %10 = vsyncpa [#allocation5], 0  ;;  %s1203_s0 = inlined_call_operand.hbm [shape: bf16[128,128], index: 0, kind: input, shape index: {}]   ;;  %s1204_s1 = inlined_call_operand.hbm [shape: bf16[128,128], index: 1, kind: input, shape index: {}]   ;;  %s1205_s2 = inlined_call_operand.hbm [shape: f32[128,128], index: 2, kind: output, shape index: {0}]   ;;  %s1206_s3 = inlined_call_operand.hbm [shape: f32[1,128], index: 3, kind: output, shape index: {1}]   ;;  %s1207_s4 = inlined_call_operand.hbm [shape: f32[1,128], index: 4, kind: output, shape index: {2}]  }
   0x1   :  { %12 = vsyncpa [#allocation5 + $0x1], 0 }
   0x2   :  { %13 = vsyncpa [#allocation8], 0 }
   0x3   :  { %14 = vsyncpa [#allocation6], 0 }
   0x4   :  { %16 = vsyncpa [#allocation6 + $0x1], 0 }
   0x5   :  { %17 = vsyncpa [#allocation11], 0  ;;  %s980_s15 = smov 0   ;;  %s982_s16 = smov 0  }
   0x6   :  { %s984_s17 = smov 0   ;;  %s986_s18 = smov 0  }
   0x7 LB: > { %s1001_s19 = sadd.s32 4294967295, %s943_s18   ;;  %s593_s20 = sadd.s32 4294967294, %s943_s18   ;;  %s943_s18 = sphi %s986_s18, %s1236_s18   ;;  %s939_s17 = sphi %s984_s17, %s1235_s17   ;;  %s935_s16 = sphi %s982_s16, %s1234_s16   ;;  %s931_s15 = sphi %s980_s15, %s1233_s15  }
   0x8   : > { %p43_p0 = scmp.ne.s32.totalorder %s935_s16, %s931_s15  ;;  %p1208_p1 = scmp.eq.s32.totalorder %s1001_s19, 0 }
   0x9   : > { %p94_p3 = scmp.eq.s32.totalorder %s593_s20, 1  ;;  %p594_p5 = scmp.ge.s32.totalorder %s943_s18, 1 }
   0xa   : > { %p1010_p4 = por %p1208_p1, %p43_p0  ;;  %p143_p7 = scmp.lt.s32.totalorder %s943_s18, 3 }
   0xb   : > { %p1015_p6 = por %p94_p3, %p43_p0  ;;  %s945_s24 = smov [#allocation7]  }
   0xc   : > { %s1212_s21 = scalar_select %p1010_p4, 1, 0 }
   0xd   : > { %s1213_s22 = scalar_select %p1015_p6, 1, 0 }
   0xe   : > { %p1021_p9 = pnand %p594_p5, %p143_p7  ;;  %s155_s25 = sshll.u32 %s945_s24, 4  ;;  %s156_s25 = int_to_ptr.vmem [resolvable:$true] %s155_s25 }
   0xf   : > { %s1035_s27 = sadd.s32 1, %s943_s18   ;;  %s30_s28 = sadd.s32 1, %s939_s17 }
  0x10   : > { %s1214_s23 = scalar_select %p1021_p9, 1, 0 }
  0x11   : > { %p697_p10 = pneg %p1021_p9  ;;  %s27_s29 = ssub.s32 %s943_s18, %s1035_s27 }
  0x12   : > { %s780_s30 = scalar_lea.vmem %s156_s25, 1024  ;;  %p788_p7 = scmp.lt.s32.totalorder %s156_s25, %s156_s25 }
  0x13   : > { %p1030_p12 = pnand %p697_p10, %p1208_p1  ;;  %p781_p0 = scmp.ne.s32.totalorder %s156_s25, %s780_s30 }
  0x14   : > { %p789_p8 = scmp.lt.s32.totalorder %s780_s30, %s780_s30 }
  0x15   : > { %p771_p13 = pneg %p1030_p12 }
  0x16   : > { %p790_p11 = por %p789_p8, %p788_p7 }
  0x17   : > { %p783_p3 = pnand %p781_p0, %p771_p13 }
  0x19   : > { %p784_p5 = pneg %p783_p3 }
  0x1b   : > { %p791_p2 = pnand %p790_p11, %p784_p5 }
  0x1d   : > { %794 = shalt.err (!%p791_p2)
}
  0x1e   : > { %s946_s5 = smov 64   ;;  %s947_s6 = smov 4  }
  0x1f   : > { %700 = dma.hbm_to_vmem [thread:$0]  (!%p1030_p12), %s1204_s1, 1024, %s156_s25, [#allocation8], %s946_s5, %s946_s5, %s947_s6  }
  0x20   : > { %p28_p2 = scmp.eq.s32.totalorder %s27_s29, 0  ;;  %p37_p8 = scmp.ne.s32.totalorder %s939_s17, %s935_s16 }
  0x21   : > { %p38_p10 = scmp.eq.s32.totalorder %s943_s18, 0  ;;  %p710_p11 = scmp.lt.s32.totalorder %s943_s18, 2 }
  0x22   : > { %s1055_s9 = scalar_select %p28_p2, %s939_s17, %s30_s28  }
  0x23   : > { %p39_p13 = por %p38_p10, %p37_p8  ;;  %p1216_p0 = scmp.eq.s32.totalorder %s1001_s19, 1 }
  0x24   : > { %s169_s11 = sand.u32 1, %s939_s17   ;;  %s627_s12 = sshll.u32 %s943_s18, 9 }
  0x25   : > { %p1059_p3 = por %p1216_p0, %p37_p8  ;;  %s597_s13 = sshll.u32 %s169_s11, 5 }
  0x26   : > { %s1068_s24 = scalar_lea.hbm %s1203_s0, %s627_s12  ;;  %s173_s25 = scalar_lea.vmem [#allocation4], %s597_s13 }
  0x27   : > { %s1217_s10 = scalar_select %p1059_p3, 1, 0 }
  0x28   : > { %s180_s26 = sshll.u32 %s173_s25, 4  ;;  %p1070_p12 = pnand %p710_p11, %p39_p13  ;;  %s1074_s26 = int_to_ptr.vmem [resolvable:$true] %s180_s26 }
  0x29   : > { %s1076_s29 = scalar_lea.sflag [#allocation5], %s169_s11  ;;  %s795_s30 = scalar_lea.hbm %s1068_s24, 512 }
  0x2a   : > { %p796_p5 = scmp.ne.s32.totalorder %s1068_s24, %s795_s30  ;;  %p797_p7 = pneg %p1070_p12 }
  0x2b   : > { %s800_s12 = scalar_lea.hbm %s1203_s0, 1024  ;;  %p801_p10 = scmp.lt.s32.totalorder %s1068_s24, %s1203_s0 }
  0x2c   : > { %p798_p2 = pnand %p797_p7, %p796_p5  ;;  %p802_p11 = scmp.lt.s32.totalorder %s800_s12, %s795_s30 }
  0x2e   : > { %p799_p8 = pneg %p798_p2  ;;  %p803_p13 = por %p802_p11, %p801_p10 }
  0x30   : > { %p804_p0 = pnand %p803_p13, %p799_p8 }
  0x32   : > { %807 = shalt.err (!%p804_p0)
}
  0x33   : > { %s808_s11 = scalar_lea.vmem %s1074_s26, 512  ;;  %s948_s20 = smov [#allocation4]  }
  0x34   : > { %p809_p1 = scmp.ne.s32.totalorder %s1074_s26, %s808_s11  ;;  %s813_s25 = sshll.u32 %s948_s20, 4  ;;  %s814_s25 = int_to_ptr.vmem [resolvable:$false] %s813_s25 }
  0x35   : > { %s815_s7 = scalar_lea.vmem %s814_s25, 1024  ;;  %p816_p2 = scmp.lt.s32.totalorder %s1074_s26, %s814_s25 }
  0x36   : > { %p811_p6 = pnand %p809_p1, %p797_p7  ;;  %p817_p3 = scmp.lt.s32.totalorder %s815_s7, %s808_s11 }
  0x38   : > { %p812_p5 = pneg %p811_p6  ;;  %p818_p4 = por %p817_p3, %p816_p2 }
  0x3a   : > { %p819_p9 = pnand %p818_p4, %p812_p5 }
  0x3c   : > { %822 = shalt.err (!%p819_p9)
}
  0x3d   : > { %704 = dma.hbm_to_vmem [thread:$0]  (!%p1070_p12), %s1068_s24, 512, %s1074_s26, %s1076_s29, %s946_s5, %s946_s5, %s947_s6  }
  0x3e   : > { %p1219_p1 = scmp.ne.s32.totalorder %s1214_s23, 0 }
  0x3f   : > { %s1103_s30 = sand.u32 (!%p1219_p1), 1, %s935_s16   ;;  %p1220_p4 = scmp.ne.s32.totalorder (!%p1219_p1), %s1212_s21, 0 }
  0x40   : > { %192 = sbr.rel (%p1219_p1) target bundleno = 410 (0x19a), region = 28  ;;  %s601_s8 = sshll.u32 (!%p1219_p1), %s1103_s30, 5 }
  0x41   : > { %s195_s12 = scalar_lea.sflag (!%p1219_p1), [#allocation5], %s1103_s30  ;;  %s1107_s13 = scalar_lea.vmem (!%p1219_p1), [#allocation4], %s601_s8 }
  0x45   : > { %914 = dma.done.wait (%p1220_p4), %s195_s12, 512  }
  0x46   : > { %916 = vsyncadd (%p1220_p4), %s195_s12, 4294966784  ;;  %p1221_p6 = scmp.eq.s32.totalorder %s1001_s19, 0 }
  0x48   : > { %918 = dma.done.wait (%p1221_p6), [#allocation8], 1024   ;;  %p1222_p9 = pmov %p1221_p6 }
  0x49   : > { %s603_s23 = sshll.u32 %s1103_s30, 6  ;;  %p1223_p3 = scmp.ne.s32.totalorder %s1001_s19, 0 }
  0x4a   : > { %920 = vsyncadd (%p1222_p9), [#allocation8], 4294966272  ;;  %s1118_s5 = scalar_lea.vmem [#allocation9], %s603_s23 }
  0x4b   : > { %233 = sbr.rel (%p1223_p3) target bundleno = 82 (0x52), region = 40 }
  0x50   : > { %v949_v0 = vmov 0.0  }
  0x51   : > { %234 = vst [vmem:[#allocation2] sm:$0x1] %v949_v0  ;;  %235 = vst [vmem:[#allocation3] sm:$0x1] %v949_v0 }
  0x52 PF: > { %v757_v1 = vld [vmem:[#allocation7 + $0x38] sm:$0xff]   ;;  %v758_v2 = vld [vmem:[#allocation7 + $0x30] sm:$0xff]   ;;  %v759_v3 = vld [vmem:[#allocation7 + $0x28] sm:$0xff]   ;;  %p617_p12 = scmp.ne.s32.totalorder %s1001_s19, 1 }
  0x53   : > { %641 = vmatprep.subr.bf16.mxu0 %v757_v1  ;;  %665 = vmatprep.subr.bf16.mxu1 %v757_v1  ;;  %v760_v4 = vld [vmem:[#allocation7 + $0x20] sm:$0xff]   ;;  %v767_v6 = vld [vmem:[%s1107_s13 + $0x10] sm:$0xff]   ;;  %v761_v7 = vld [vmem:[#allocation7 + $0x18] sm:$0xff]  }
  0x54   : > { %642 = vmatpush3.bf16.msra.mxu0 %v757_v1  ;;  %673 = vmatpush3.bf16.msra.mxu1 %v757_v1  ;;  %v765_v5 = vld [vmem:[%s1107_s13] sm:$0xff]   ;;  %v762_v8 = vld [vmem:[#allocation7 + $0x10] sm:$0xff]   ;;  %v763_v9 = vld [vmem:[#allocation7 + $0x8] sm:$0xff]  }
  0x55   : > { %643 = vmatprep.subr.bf16.mxu0 %v758_v2  ;;  %666 = vmatprep.subr.bf16.mxu1 %v758_v2  ;;  %v764_v10 = vld [vmem:[#allocation7] sm:$0xff]   ;;  %v766_v11 = vld [vmem:[%s1107_s13 + $0x8] sm:$0xff]   ;;  %v768_v12 = vld [vmem:[%s1107_s13 + $0x18] sm:$0xff]  }
  0x56   : > { %657 = vmatprep.mubr.bf16.mxu0 %v765_v5  ;;  %661 = vmatprep.mubr.bf16.mxu1 %v767_v6 }
  0x58   : > { %644 = vmatpush3.bf16.msra.mxu0 %v758_v2  ;;  %674 = vmatpush3.bf16.msra.mxu1 %v758_v2  ;;  %v405_v52 = vld [vmem:[#allocation2] sm:$0x1]  ;;  %v421_v55 = vld [vmem:[#allocation3] sm:$0x1] }
  0x59   : > { %645 = vmatprep.subr.bf16.mxu0 %v759_v3  ;;  %667 = vmatprep.subr.bf16.mxu1 %v759_v3 }
  0x5c   : > { %646 = vmatpush3.bf16.msra.mxu0 %v759_v3  ;;  %675 = vmatpush3.bf16.msra.mxu1 %v759_v3 }
  0x5d   : > { %647 = vmatprep.subr.bf16.mxu0 %v760_v4  ;;  %668 = vmatprep.subr.bf16.mxu1 %v760_v4 }
  0x60   : > { %648 = vmatpush3.bf16.msra.mxu0 %v760_v4  ;;  %676 = vmatpush3.bf16.msra.mxu1 %v760_v4 }
  0x61   : > { %649 = vmatprep.subr.bf16.mxu0 %v761_v7  ;;  %669 = vmatprep.subr.bf16.mxu1 %v761_v7 }
  0x64   : > { %650 = vmatpush3.bf16.msra.mxu0 %v761_v7  ;;  %677 = vmatpush3.bf16.msra.mxu1 %v761_v7 }
  0x65   : > { %651 = vmatprep.subr.bf16.mxu0 %v762_v8  ;;  %670 = vmatprep.subr.bf16.mxu1 %v762_v8 }
  0x68   : > { %652 = vmatpush3.bf16.msra.mxu0 %v762_v8  ;;  %678 = vmatpush3.bf16.msra.mxu1 %v762_v8 }
  0x69   : > { %653 = vmatprep.subr.bf16.mxu0 %v763_v9  ;;  %671 = vmatprep.subr.bf16.mxu1 %v763_v9 }
  0x6c   : > { %654 = vmatpush3.bf16.msra.mxu0 %v763_v9  ;;  %679 = vmatpush3.bf16.msra.mxu1 %v763_v9 }
  0x6d   : > { %655 = vmatprep.subr.bf16.mxu0 %v764_v10  ;;  %672 = vmatprep.subr.bf16.mxu1 %v764_v10 }
  0x70   : > { %656 = vmatpush3.bf16.msra.mxu0 %v764_v10  ;;  %680 = vmatpush3.bf16.msra.mxu1 %v764_v10 }
  0x73   : > { %658 = vmatmul.mubr.bf16.vlgmr.msra.gmra.mxu0 %v766_v11  ;;  %662 = vmatmul.mubr.bf16.vlgmr.msra.gmra.mxu1 %v768_v12 }
 0x133   : > { %v659_v13 = vpop.f32.mrf.mxu0  ;;  %v663_v14 = vpop.f32.mrf.mxu1 }
 0x134   : > { %399 = vst [vmem:[%s1118_s5 + $0x10] sm:$0xff] %v659_v13  ;;  %403 = vst [vmem:[%s1118_s5 + $0x30] sm:$0xff] %v663_v14  ;;  %v424_v24 = vmul.f32 %v659_v13, %v659_v13  ;;  %v428_v36 = vmul.f32 %v663_v14, %v663_v14 }
 0x135   : > { %v366_v15 = vpop.f32.mrf.mxu0  ;;  %v382_v16 = vpop.f32.mrf.mxu1 }
 0x136   : > { %397 = vst [vmem:[%s1118_s5] sm:$0xff] %v366_v15  ;;  %401 = vst [vmem:[%s1118_s5 + $0x20] sm:$0xff] %v382_v16  ;;  %v422_v21 = vmul.f32 %v366_v15, %v366_v15  ;;  %v426_v30 = vmul.f32 %v382_v16, %v382_v16 }
 0x137   : > { %v660_v17 = vpop.f32.mrf.mxu0  ;;  %v664_v18 = vpop.f32.mrf.mxu1 }
 0x138   : > { %400 = vst [vmem:[%s1118_s5 + $0x18] sm:$0xff] %v660_v17  ;;  %404 = vst [vmem:[%s1118_s5 + $0x38] sm:$0xff] %v664_v18  ;;  %v425_v27 = vmul.f32 %v660_v17, %v660_v17  ;;  %v429_v39 = vmul.f32 %v664_v18, %v664_v18 }
 0x139   : > { %v369_v19 = vpop.f32.mrf.mxu0  ;;  %v385_v20 = vpop.f32.mrf.mxu1 }
 0x13a   : > { %398 = vst [vmem:[%s1118_s5 + $0x8] sm:$0xff] %v369_v19  ;;  %v406_v22 = vadd.f32 %v369_v19, %v366_v15  ;;  %v423_v23 = vmul.f32 %v369_v19, %v369_v19  ;;  %402 = vst [vmem:[%s1118_s5 + $0x28] sm:$0xff] %v385_v20  ;;  %v427_v34 = vmul.f32 %v385_v20, %v385_v20 }
 0x13c   : > { %v407_v25 = vadd.f32 %v659_v13, %v406_v22  ;;  %v430_v26 = vadd.f32 %v423_v23, %v422_v21 }
 0x13e   : > { %v431_v28 = vadd.f32 %v430_v26, %v424_v24  ;;  %v408_v29 = vadd.f32 %v660_v17, %v407_v25 }
 0x140   : > { %v409_v31 = vadd.f32 %v408_v29, %v382_v16  ;;  %v432_v32 = vadd.f32 %v431_v28, %v425_v27 }
 0x142   : > { %v410_v33 = vadd.f32 %v409_v31, %v385_v20  ;;  %v433_v35 = vadd.f32 %v432_v32, %v426_v30 }
 0x144   : > { %v411_v37 = vadd.f32 %v663_v14, %v410_v33  ;;  %v434_v38 = vadd.f32 %v433_v35, %v427_v34 }
 0x146   : > { %v412_v40 = vadd.f32 %v664_v18, %v411_v37  ;;  %v435_v41 = vadd.f32 %v434_v38, %v428_v36 }
 0x148   : > { %v413_v42 = vrot.slane %v412_v40, 4  ;;  %v436_v43 = vadd.f32 %v435_v41, %v429_v39 }
 0x14a   : > { %v414_v44 = vadd.f32 %v413_v42, %v412_v40  ;;  %v437_v45 = vrot.slane %v436_v43, 4 }
 0x14c   : > { %v415_v46 = vrot.slane %v414_v44, 2  ;;  %v438_v47 = vadd.f32 %v437_v45, %v436_v43 }
 0x14e   : > { %v416_v48 = vadd.f32 %v415_v46, %v414_v44  ;;  %v439_v49 = vrot.slane %v438_v47, 2 }
 0x150   : > { %v417_v50 = vrot.slane %v416_v48, 1  ;;  %v440_v51 = vadd.f32 %v439_v49, %v438_v47 }
 0x152   : > { %v418_v53 = vadd.f32 %v417_v50, %v416_v48  ;;  %v441_v54 = vrot.slane %v440_v51, 1 }
 0x154   : > { %v419_v56 = vadd.f32 %v418_v53, %v405_v52  ;;  %v442_v57 = vadd.f32 %v441_v54, %v440_v51  ;;  %448 = sbr.rel (%p617_p12) target bundleno = 353 (0x161), region = 44 }
 0x156   : > { %420 = vst [vmem:[#allocation2] sm:$0x1] %v419_v56  ;;  %v443_v58 = vadd.f32 %v442_v57, %v421_v55 }
 0x158   : > { %444 = vst [vmem:[#allocation3] sm:$0x1] %v443_v58 }
 0x15d   : > { %v449_v59 = vld [vmem:[#allocation2] sm:$0x1] }
 0x15e   : > { %450 = vst [vmem:[#allocation10] sm:$0x1] %v449_v59 }
 0x15f   : > { %v451_v60 = vld [vmem:[#allocation3] sm:$0x1] }
 0x160   : > { %452 = vst [vmem:[#allocation12] sm:$0x1] %v451_v60 }
 0x161 PF: > { %s950_s21 = smov [#allocation10]   ;;  %s628_s24 = sshll.u32 %s1001_s19, 10 }
 0x162   : > { %s481_s6 = sshll.u32 %s950_s21, 4  ;;  %s1139_s29 = scalar_lea.hbm %s1205_s2, %s628_s24  ;;  %s482_s6 = int_to_ptr.vmem [resolvable:$true] %s481_s6 }
 0x163   : > { %s823_s14 = scalar_lea.vmem %s482_s6, 16  ;;  %p1224_p8 = scmp.eq.s32.totalorder %s1001_s19, 1 }
 0x164   : > { %p824_p7 = scmp.ne.s32.totalorder %s482_s6, %s823_s14  ;;  %s829_s11 = scalar_lea.vmem %s482_s6, 32 }
 0x165   : > { %p830_p13 = scmp.lt.s32.totalorder %s482_s6, %s482_s6  ;;  %p831_p0 = scmp.lt.s32.totalorder %s829_s11, %s823_s14 }
 0x166   : > { %p825_p10 = pnand %p824_p7, %p1224_p8 }
 0x167   : > { %p832_p5 = por %p831_p0, %p830_p13 }
 0x168   : > { %p826_p11 = pneg %p825_p10 }
 0x16a   : > { %p833_p2 = pnand %p832_p5, %p826_p11 }
 0x16c   : > { %836 = shalt.err (!%p833_p2)
}
 0x16d   : > { %p1225_p1 = pmov %p1224_p8  ;;  %s467_s7 = sshll.u32 %s1118_s5, 4  ;;  %s1149_s7 = int_to_ptr.vmem [resolvable:$true] %s467_s7 }
 0x16e   : > { %s454_s8 = scalar_lea.sflag [#allocation6], %s1103_s30  ;;  %s847_s12 = scalar_lea.vmem %s1149_s7, 1024 }
 0x16f   : > { %689 = dma.vmem_to_hbm [thread:$0]  (%p1225_p1), %s482_s6, 16, %s1206_s3, [#allocation11]  }
 0x170   : > { %p848_p4 = scmp.ne.s32.totalorder %s1149_s7, %s847_s12  ;;  %p1226_p6 = scmp.ne.s32.totalorder %s1217_s10, 0 }
 0x171   : > { %s951_s13 = smov [#allocation9]  }
 0x172   : > { %p849_p9 = pnand %p848_p4, %p1226_p6  ;;  %s851_s23 = sshll.u32 %s951_s13, 4  ;;  %s852_s23 = int_to_ptr.vmem [resolvable:$false] %s851_s23 }
 0x173   : > { %s853_s21 = scalar_lea.vmem %s852_s23, 2048  ;;  %p854_p12 = scmp.lt.s32.totalorder %s1149_s7, %s852_s23 }
 0x174   : > { %p850_p3 = pneg %p849_p9  ;;  %p855_p7 = scmp.lt.s32.totalorder %s853_s21, %s847_s12 }
 0x176   : > { %p856_p8 = por %p855_p7, %p854_p12 }
 0x178   : > { %p857_p10 = pnand %p856_p8, %p850_p3 }
 0x17a   : > { %860 = shalt.err (!%p857_p10)
}
 0x17b   : > { %s861_s5 = scalar_lea.hbm %s1139_s29, 1024  ;;  %s865_s26 = scalar_lea.hbm %s1205_s2, 2048 }
 0x17c   : > { %p862_p11 = scmp.ne.s32.totalorder %s1139_s29, %s861_s5  ;;  %p866_p5 = scmp.lt.s32.totalorder %s1139_s29, %s1205_s2 }
 0x17d   : > { %p867_p2 = scmp.lt.s32.totalorder %s865_s26, %s861_s5 }
 0x17e   : > { %p863_p13 = pnand %p862_p11, %p1226_p6 }
 0x17f   : > { %p868_p1 = por %p867_p2, %p866_p5 }
 0x180   : > { %p864_p0 = pneg %p863_p13 }
 0x182   : > { %p869_p4 = pnand %p868_p1, %p864_p0 }
 0x184   : > { %872 = shalt.err (!%p869_p4)
}
 0x185   : > { %s952_s11 = smov 128   ;;  %s953_s20 = smov 8  }
 0x186   : > { %687 = dma.vmem_to_hbm [thread:$0]  (%p1226_p6), %s1149_s7, 1024, %s1139_s29, %s454_s8, %s952_s11, %s952_s11, %s953_s20  }
 0x187   : > { %s954_s25 = smov [#allocation12]   ;;  %p1227_p3 = scmp.eq.s32.totalorder %s1001_s19, 1 }
 0x188   : > { %s492_s12 = sshll.u32 %s954_s25, 4  ;;  %s493_s12 = int_to_ptr.vmem [resolvable:$true] %s492_s12 }
 0x189   : > { %s873_s13 = scalar_lea.vmem %s493_s12, 16  ;;  %s879_s23 = scalar_lea.vmem %s493_s12, 32 }
 0x18a   : > { %p874_p9 = scmp.ne.s32.totalorder %s493_s12, %s873_s13  ;;  %p880_p8 = scmp.lt.s32.totalorder %s493_s12, %s493_s12 }
 0x18b   : > { %p881_p10 = scmp.lt.s32.totalorder %s879_s23, %s873_s13 }
 0x18c   : > { %p875_p12 = pnand %p874_p9, %p1227_p3 }
 0x18d   : > { %p882_p11 = por %p881_p10, %p880_p8 }
 0x18e   : > { %p876_p7 = pneg %p875_p12 }
 0x190   : > { %p883_p13 = pnand %p882_p11, %p876_p7 }
 0x192   : > { %886 = shalt.err (!%p883_p13)
}
 0x193   : > { %p1228_p0 = pmov %p1227_p3 }
 0x195   : > { %691 = dma.vmem_to_hbm [thread:$0]  (%p1228_p0), %s493_s12, 16, %s1207_s4, [#allocation11]  }
 0x196   : > { %p1229_p6 = pmov %p1228_p0 }
 0x197   : > { %p1230_p5 = pmov %p1228_p0 }
 0x198   : > { %922 = dma.done.wait (%p1229_p6), [#allocation11], 32  }
 0x199   : > { %924 = vsyncadd (%p1230_p5), [#allocation11], 4294967264 }
 0x19a PF: > { %s512_s30 = sand.u32 1, %s931_s15   ;;  %p1231_p2 = scmp.ne.s32.totalorder %s1213_s22, 0 }
 0x19b   : > { %p1232_p1 = scmp.ge.s32.totalorder %s943_s18, 2  ;;  %s513_s29 = scalar_lea.sflag [#allocation6], %s512_s30 }
 0x19d   : > { %p706_p4 = pnand %p1232_p1, %p1231_p2 }
 0x19f   : > { %p707_p9 = pneg %p706_p4 }
 0x1a1   : > { %926 = dma.done.wait (%p707_p9), %s513_s29, 1024  }
 0x1a2   : > { %928 = vsyncadd (%p707_p9), %s513_s29, 4294966272  ;;  %p20_p3 = scmp.ge.s32.totalorder %s1035_s27, 4   ;;  %s1233_s15 = smov %s935_s16 }
 0x1a3   : > { %s1234_s16 = smov %s939_s17  ;;  %s1235_s17 = smov %s1055_s9 }
 0x1a4   : > { %s1236_s18 = smov %s1035_s27  ;;  %22 = sbr.rel (!%p20_p3) target bundleno = 7 (0x7), region = 101 }
 0x1a9   :  { %518 = vsyncpa [#allocation5], 1 }
 0x1aa   :  { %520 = vsyncpa [#allocation5 + $0x1], 1 }
 0x1ab   :  { %521 = vsyncpa [#allocation8], 1 }
 0x1ac   :  { %522 = vsyncpa [#allocation6], 1 }
 0x1ad   :  { %524 = vsyncpa [#allocation6 + $0x1], 1 }
 0x1ae   :  { %525 = vsyncpa [#allocation11], 1 }

</bundles_post_ra>
